<compile_context>
chip_gen: v7x
topology: tpu7x:2x2x1
jax: 0.10.0
libtpu: 0.0.40
codegen_flags: <defaults>
</compile_context>

<pallas_src>
import jax
import jax.numpy as jnp
from jax.experimental import pallas as pl
from jax.experimental.pallas import tpu as pltpu


def _choose_x_block(n_x: int, batch: int, max_block: int = 8) -> int:
    """Pick XB | n_x so that XB*batch is sublane-aligned and (if possible) grid >= 2."""
    best_score, best_xb = None, n_x
    for xb in range(min(n_x, max_block), 0, -1):
        if n_x % xb:
            continue
        rows_aligned = (xb * batch) % 8 == 0
        multi_step = (n_x // xb) >= 2
        score = (rows_aligned, multi_step, xb)
        if best_score is None or score > best_score:
            best_score, best_xb = score, xb
    if (best_xb * batch) % 8 != 0:
        # Fall back to a full-extent row block, which is always a legal block shape.
        best_xb = n_x
    return best_xb


def spectral_time_series_conv(x, w_re, w_im, n_output_time_steps, *, x_block=None):
    """x: (B, T_in, X) float32; w_re/w_im: (M_in, M_out, X) float32 (complex weights)."""
    B, T_in, X = x.shape
    M_in = T_in // 2 + 1
    T_out = int(n_output_time_steps)
    M_out = T_out // 2 + 1
    assert w_re.shape == (M_in, M_out, X) and w_im.shape == (M_in, M_out, X)

    XB = _choose_x_block(X, B) if x_block is None else int(x_block)
    assert X % XB == 0
    R = XB * B                     # merged rows per grid step (MXU M-dimension)
    grid = (X // XB,)

    # ---- Forward real-DFT matrices (rfft): F = x @ (c_re + i*c_im). ---------------------
    # Phase computed as (t*m) mod T in integers so the angle stays exact for large T.
    t_in = jnp.arange(T_in, dtype=jnp.int32)[:, None]
    m_in = jnp.arange(M_in, dtype=jnp.int32)[None, :]
    ang_in = (2.0 * jnp.pi / T_in) * jnp.mod(t_in * m_in, T_in).astype(jnp.float32)
    c_re = jnp.cos(ang_in)                                   # (T_in, M_in)
    c_im = -jnp.sin(ang_in)                                  # (T_in, M_in)

    # ---- Inverse real-DFT matrices (irfft), 1/T_out and one-sided mode weights baked in. -
    o_m = jnp.arange(M_out, dtype=jnp.int32)[:, None]
    t_o = jnp.arange(T_out, dtype=jnp.int32)[None, :]
    ang_out = (2.0 * jnp.pi / T_out) * jnp.mod(o_m * t_o, T_out).astype(jnp.float32)
    mode_w = jnp.full((M_out, 1), 2.0, dtype=jnp.float32)
    mode_w = mode_w.at[0, 0].set(1.0)
    if T_out % 2 == 0:
        mode_w = mode_w.at[M_out - 1, 0].set(1.0)
    d_c = mode_w * jnp.cos(ang_out) / T_out                  # (M_out, T_out)
    d_s = -mode_w * jnp.sin(ang_out) / T_out                 # (M_out, T_out)

    # ---- Parameter-side packing (done once per parameter set in a real model). ----------
    w_re_x = jnp.transpose(w_re, (2, 0, 1)).astype(jnp.float32)   # (X, M_in, M_out)
    w_im_x = jnp.transpose(w_im, (2, 0, 1)).astype(jnp.float32)   # (X, M_in, M_out)
    w_sum_x = w_re_x + w_im_x                                     # Gauss-trick operand

    # ---- Input relayout: (B, T_in, X) -> (X*B, T_in) merged rows (x major, b minor). ----
    x_m = jnp.transpose(x, (2, 0, 1)).reshape(X * B, T_in).astype(jnp.float32)

    def kernel(x_ref, wre_ref, wim_ref, wsum_ref, cre_ref, cim_ref, dc_ref, ds_ref,
               o_ref, fre_s, fim_s, yre_s, yim_s):
        xm = x_ref[...]                                      # (R, T_in) merged (x, b) rows

        # Forward real DFT, merged over all XB*B rows -> large MXU M-dimension.
        fre_s[...] = jnp.dot(xm, cre_ref[...], preferred_element_type=jnp.float32)
        fim_s[...] = jnp.dot(xm, cim_ref[...], preferred_element_type=jnp.float32)

        # Per-state-variable complex mode mixing, Gauss 3-multiplication form:
        #   t1 = Fr@Wr, t2 = Fi@Wi, t3 = (Fr+Fi)@(Wr+Wi); Yr = t1 - t2, Yi = t3 - t1 - t2.
        # XB is small (<= 8) so a static Python loop keeps everything 2-D (no reshapes).
        for xi in range(XB):
            rows = pl.ds(xi * B, B)
            fr = fre_s[rows, :]                              # (B, M_in)
            fi = fim_s[rows, :]
            wre = wre_ref[xi]                                # (M_in, M_out)
            wim = wim_ref[xi]
            wsum = wsum_ref[xi]
            t1 = jnp.dot(fr, wre, preferred_element_type=jnp.float32)
            t2 = jnp.dot(fi, wim, preferred_element_type=jnp.float32)
            t3 = jnp.dot(fr + fi, wsum, preferred_element_type=jnp.float32)
            yre_s[rows, :] = t1 - t2
            yim_s[rows, :] = t3 - t1 - t2

        # Inverse real DFT, merged rows again -> one large matmul per stage.
        out = (jnp.dot(yre_s[...], dc_ref[...], preferred_element_type=jnp.float32)
               + jnp.dot(yim_s[...], ds_ref[...], preferred_element_type=jnp.float32))
        o_ref[...] = out.astype(o_ref.dtype)

    # Explicit VMEM budget (matters on v7x's 64 MiB VMEM): double-buffered data blocks,
    # constant DFT matrices, and the in-kernel scratch.
    need = 4 * (2 * R * T_in
                + 2 * 3 * XB * M_in * M_out
                + 2 * (2 * T_in * M_in + 2 * M_out * T_out)
                + 2 * R * T_out
                + R * (2 * M_in + 2 * M_out))
    vmem_limit = int(min(48 * 2**20, max(16 * 2**20, 2 * need)))

    out_m = pl.pallas_call(
        kernel,
        out_shape=jax.ShapeDtypeStruct((X * B, T_out), jnp.float32),
        grid_spec=pltpu.PrefetchScalarGridSpec(
            num_scalar_prefetch=0,
            grid=grid,
            in_specs=[
                pl.BlockSpec((R, T_in), lambda i: (i, 0)),                 # merged x rows
                pl.BlockSpec((XB, M_in, M_out), lambda i: (i, 0, 0)),      # W_re
                pl.BlockSpec((XB, M_in, M_out), lambda i: (i, 0, 0)),      # W_im
                pl.BlockSpec((XB, M_in, M_out), lambda i: (i, 0, 0)),      # W_re + W_im
                pl.BlockSpec((T_in, M_in), lambda i: (0, 0)),              # c_re (constant)
                pl.BlockSpec((T_in, M_in), lambda i: (0, 0)),              # c_im (constant)
                pl.BlockSpec((M_out, T_out), lambda i: (0, 0)),            # d_c  (constant)
                pl.BlockSpec((M_out, T_out), lambda i: (0, 0)),            # d_s  (constant)
            ],
            out_specs=pl.BlockSpec((R, T_out), lambda i: (i, 0)),
            scratch_shapes=[
                pltpu.VMEM((R, M_in), jnp.float32),    # F_re
                pltpu.VMEM((R, M_in), jnp.float32),    # F_im
                pltpu.VMEM((R, M_out), jnp.float32),   # Y_re
                pltpu.VMEM((R, M_out), jnp.float32),   # Y_im
            ],
        ),
        compiler_params=pltpu.CompilerParams(
            dimension_semantics=("parallel",),
            vmem_limit_bytes=vmem_limit,
        ),
    )(x_m, w_re_x, w_im_x, w_sum_x, c_re, c_im, d_c, d_s)

    # Output relayout: (X*B, T_out) -> (B, T_out, X)  (PyTorch layout).
    return jnp.transpose(out_m.reshape(X, B, T_out), (1, 2, 0))


def reference_forward(x, w_re, w_im, n_output_time_steps):
    """Pure-JAX reference matching the PyTorch module exactly."""
    f = jnp.fft.rfft(x, n=x.shape[1], axis=1)
    w = (w_re + 1j * w_im).astype(jnp.complex64)
    y = jnp.einsum('bix,iox->box', f.astype(jnp.complex64), w)
    return jnp.fft.irfft(y, n=n_output_time_steps, axis=1).astype(jnp.float32)


if __name__ == "__main__":
    def run_case(B, T_IN, T_OUT, X, seed):
        # NOTE: the einsum 'bix,iox->box' requires n_input_state_variables ==
        # n_output_state_variables, so both are set to X.
        M_IN, M_OUT = T_IN // 2 + 1, T_OUT // 2 + 1
        key = jax.random.PRNGKey(seed)
        k_x, k_wr, k_wi = jax.random.split(key, 3)
        x = jax.random.normal(k_x, (B, T_IN, X), dtype=jnp.float32)
        # torch.rand(..., dtype=torch.cfloat): real and imag each uniform in [0, 1)
        w_re = jax.random.uniform(k_wr, (M_IN, M_OUT, X), dtype=jnp.float32)
        w_im = jax.random.uniform(k_wi, (M_IN, M_OUT, X), dtype=jnp.float32)

        out = jax.block_until_ready(spectral_time_series_conv(x, w_re, w_im, T_OUT))
        ref = reference_forward(x, w_re, w_im, T_OUT)
        assert out.shape == (B, T_OUT, X) and out.dtype == jnp.float32
        err = jnp.max(jnp.abs(out - ref))
        assert jnp.allclose(out, ref, atol=2e-3, rtol=2e-3), f"max abs err {err}"

    # Small shapes consistent with the module's forward pass.
    run_case(B=2, T_IN=8, T_OUT=16, X=4, seed=0)     # single grid step, full-X block
    run_case(B=2, T_IN=16, T_OUT=32, X=16, seed=1)   # blocked path: XB=8, grid of 2 steps

    print("KERNEL_OK")
</pallas_src>

<mosaic_0001>
module attributes {stable_mosaic.version = 11 : i64} {
  func.func @kernel(%arg0: i32, %arg1: memref<8x8xf32, #tpu.memory_space<vmem>>, %arg2: memref<4x5x9xf32, #tpu.memory_space<vmem>>, %arg3: memref<4x5x9xf32, #tpu.memory_space<vmem>>, %arg4: memref<4x5x9xf32, #tpu.memory_space<vmem>>, %arg5: memref<8x5xf32, #tpu.memory_space<vmem>>, %arg6: memref<8x5xf32, #tpu.memory_space<vmem>>, %arg7: memref<9x16xf32, #tpu.memory_space<vmem>>, %arg8: memref<9x16xf32, #tpu.memory_space<vmem>>, %arg9: memref<8x16xf32, #tpu.memory_space<vmem>>, %arg10: memref<8x5xf32, #tpu.memory_space<vmem>>, %arg11: memref<8x5xf32, #tpu.memory_space<vmem>>, %arg12: memref<8x9xf32, #tpu.memory_space<vmem>>, %arg13: memref<8x9xf32, #tpu.memory_space<vmem>>) attributes {dimension_semantics = [#tpu.dimension_semantics<parallel>], iteration_bounds = array<i64: 1>, scalar_prefetch = 0 : i64, scratch_operands = 4 : i64, tpu.core_type = #tpu.core_type<tc>, window_params = [{transform_indices = @transform_0, window_bounds = array<i64: 8, 8>}, {transform_indices = @transform_1, window_bounds = array<i64: 4, 5, 9>}, {transform_indices = @transform_2, window_bounds = array<i64: 4, 5, 9>}, {transform_indices = @transform_3, window_bounds = array<i64: 4, 5, 9>}, {pipeline_mode = #tpu.pipeline_mode<synchronous>, transform_indices = @transform_4, window_bounds = array<i64: 8, 5>}, {pipeline_mode = #tpu.pipeline_mode<synchronous>, transform_indices = @transform_5, window_bounds = array<i64: 8, 5>}, {pipeline_mode = #tpu.pipeline_mode<synchronous>, transform_indices = @transform_6, window_bounds = array<i64: 9, 16>}, {pipeline_mode = #tpu.pipeline_mode<synchronous>, transform_indices = @transform_7, window_bounds = array<i64: 9, 16>}, {transform_indices = @transform_8, window_bounds = array<i64: 8, 16>}]} {
    %c0 = arith.constant 0 : index
    %c0_0 = arith.constant 0 : index
    %0 = vector.load %arg1[%c0, %c0_0] : memref<8x8xf32, #tpu.memory_space<vmem>>, vector<8x8xf32>
    %c0_1 = arith.constant 0 : index
    %c0_2 = arith.constant 0 : index
    %1 = vector.load %arg5[%c0_1, %c0_2] : memref<8x5xf32, #tpu.memory_space<vmem>>, vector<8x5xf32>
    %cst = arith.constant dense<0.000000e+00> : vector<8x5xf32>
    %2 = tpu.matmul %0, %1, %cst {dimension_numbers = #tpu.dot_dimension_numbers<[1], [0], [0], [1], [0, 0, 1, 1], [], []>} : vector<8x8xf32>, vector<8x5xf32>, vector<8x5xf32> -> vector<8x5xf32>
    %c0_3 = arith.constant 0 : index
    %c0_4 = arith.constant 0 : index
    %3 = vector.load %arg10[%c0_3, %c0_4] : memref<8x5xf32, #tpu.memory_space<vmem>>, vector<8x5xf32>
    tpu.vector_store %arg10[%c0_3, %c0_4], %2 {strides = array<i32>} : memref<8x5xf32, #tpu.memory_space<vmem>>, vector<8x5xf32>,
    %c0_5 = arith.constant 0 : index
    %c0_6 = arith.constant 0 : index
    %4 = vector.load %arg6[%c0_5, %c0_6] : memref<8x5xf32, #tpu.memory_space<vmem>>, vector<8x5xf32>
    %cst_7 = arith.constant dense<0.000000e+00> : vector<8x5xf32>
    %5 = tpu.matmul %0, %4, %cst_7 {dimension_numbers = #tpu.dot_dimension_numbers<[1], [0], [0], [1], [0, 0, 1, 1], [], []>} : vector<8x8xf32>, vector<8x5xf32>, vector<8x5xf32> -> vector<8x5xf32>
    %c0_8 = arith.constant 0 : index
    %c0_9 = arith.constant 0 : index
    %6 = vector.load %arg11[%c0_8, %c0_9] : memref<8x5xf32, #tpu.memory_space<vmem>>, vector<8x5xf32>
    tpu.vector_store %arg11[%c0_8, %c0_9], %5 {strides = array<i32>} : memref<8x5xf32, #tpu.memory_space<vmem>>, vector<8x5xf32>,
    %c0_10 = arith.constant 0 : index
    %c0_11 = arith.constant 0 : index
    %7 = vector.load %arg10[%c0_10, %c0_11] : memref<8x5xf32, #tpu.memory_space<vmem>>, vector<2x5xf32>
    %c0_12 = arith.constant 0 : index
    %c0_13 = arith.constant 0 : index
    %8 = vector.load %arg11[%c0_12, %c0_13] : memref<8x5xf32, #tpu.memory_space<vmem>>, vector<2x5xf32>
    %c0_14 = arith.constant 0 : index
    %c0_15 = arith.constant 0 : index
    %c0_16 = arith.constant 0 : index
    %9 = vector.load %arg2[%c0_14, %c0_15, %c0_16] : memref<4x5x9xf32, #tpu.memory_space<vmem>>, vector<1x5x9xf32>
    %10 = vector.shape_cast %9 : vector<1x5x9xf32> to vector<5x9xf32>
    %c0_17 = arith.constant 0 : index
    %c0_18 = arith.constant 0 : index
    %c0_19 = arith.constant 0 : index
    %11 = vector.load %arg3[%c0_17, %c0_18, %c0_19] : memref<4x5x9xf32, #tpu.memory_space<vmem>>, vector<1x5x9xf32>
    %12 = vector.shape_cast %11 : vector<1x5x9xf32> to vector<5x9xf32>
    %c0_20 = arith.constant 0 : index
    %c0_21 = arith.constant 0 : index
    %c0_22 = arith.constant 0 : index
    %13 = vector.load %arg4[%c0_20, %c0_21, %c0_22] : memref<4x5x9xf32, #tpu.memory_space<vmem>>, vector<1x5x9xf32>
    %14 = vector.shape_cast %13 : vector<1x5x9xf32> to vector<5x9xf32>
    %cst_23 = arith.constant dense<0.000000e+00> : vector<2x9xf32>
    %15 = tpu.matmul %7, %10, %cst_23 {dimension_numbers = #tpu.dot_dimension_numbers<[1], [0], [0], [1], [0, 0, 1, 1], [], []>} : vector<2x5xf32>, vector<5x9xf32>, vector<2x9xf32> -> vector<2x9xf32>
    %cst_24 = arith.constant dense<0.000000e+00> : vector<2x9xf32>
    %16 = tpu.matmul %8, %12, %cst_24 {dimension_numbers = #tpu.dot_dimension_numbers<[1], [0], [0], [1], [0, 0, 1, 1], [], []>} : vector<2x5xf32>, vector<5x9xf32>, vector<2x9xf32> -> vector<2x9xf32>
    %17 = arith.addf %7, %8 : vector<2x5xf32>
    %cst_25 = arith.constant dense<0.000000e+00> : vector<2x9xf32>
    %18 = tpu.matmul %17, %14, %cst_25 {dimension_numbers = #tpu.dot_dimension_numbers<[1], [0], [0], [1], [0, 0, 1, 1], [], []>} : vector<2x5xf32>, vector<5x9xf32>, vector<2x9xf32> -> vector<2x9xf32>
    %19 = arith.subf %15, %16 : vector<2x9xf32>
    %c0_26 = arith.constant 0 : index
    %c0_27 = arith.constant 0 : index
    %20 = vector.load %arg12[%c0_26, %c0_27] : memref<8x9xf32, #tpu.memory_space<vmem>>, vector<2x9xf32>
    tpu.vector_store %arg12[%c0_26, %c0_27], %19 {strides = array<i32>} : memref<8x9xf32, #tpu.memory_space<vmem>>, vector<2x9xf32>,
    %21 = arith.subf %18, %15 : vector<2x9xf32>
    %22 = arith.subf %21, %16 : vector<2x9xf32>
    %c0_28 = arith.constant 0 : index
    %c0_29 = arith.constant 0 : index
    %23 = vector.load %arg13[%c0_28, %c0_29] : memref<8x9xf32, #tpu.memory_space<vmem>>, vector<2x9xf32>
    tpu.vector_store %arg13[%c0_28, %c0_29], %22 {strides = array<i32>} : memref<8x9xf32, #tpu.memory_space<vmem>>, vector<2x9xf32>,
    %c2 = arith.constant 2 : index
    %c0_30 = arith.constant 0 : index
    %24 = vector.load %arg10[%c2, %c0_30] : memref<8x5xf32, #tpu.memory_space<vmem>>, vector<2x5xf32>
    %c2_31 = arith.constant 2 : index
    %c0_32 = arith.constant 0 : index
    %25 = vector.load %arg11[%c2_31, %c0_32] : memref<8x5xf32, #tpu.memory_space<vmem>>, vector<2x5xf32>
    %c1 = arith.constant 1 : index
    %c0_33 = arith.constant 0 : index
    %c0_34 = arith.constant 0 : index
    %26 = vector.load %arg2[%c1, %c0_33, %c0_34] : memref<4x5x9xf32, #tpu.memory_space<vmem>>, vector<1x5x9xf32>
    %27 = vector.shape_cast %26 : vector<1x5x9xf32> to vector<5x9xf32>
    %c1_35 = arith.constant 1 : index
    %c0_36 = arith.constant 0 : index
    %c0_37 = arith.constant 0 : index
    %28 = vector.load %arg3[%c1_35, %c0_36, %c0_37] : memref<4x5x9xf32, #tpu.memory_space<vmem>>, vector<1x5x9xf32>
    %29 = vector.shape_cast %28 : vector<1x5x9xf32> to vector<5x9xf32>
    %c1_38 = arith.constant 1 : index
    %c0_39 = arith.constant 0 : index
    %c0_40 = arith.constant 0 : index
    %30 = vector.load %arg4[%c1_38, %c0_39, %c0_40] : memref<4x5x9xf32, #tpu.memory_space<vmem>>, vector<1x5x9xf32>
    %31 = vector.shape_cast %30 : vector<1x5x9xf32> to vector<5x9xf32>
    %cst_41 = arith.constant dense<0.000000e+00> : vector<2x9xf32>
    %32 = tpu.matmul %24, %27, %cst_41 {dimension_numbers = #tpu.dot_dimension_numbers<[1], [0], [0], [1], [0, 0, 1, 1], [], []>} : vector<2x5xf32>, vector<5x9xf32>, vector<2x9xf32> -> vector<2x9xf32>
    %cst_42 = arith.constant dense<0.000000e+00> : vector<2x9xf32>
    %33 = tpu.matmul %25, %29, %cst_42 {dimension_numbers = #tpu.dot_dimension_numbers<[1], [0], [0], [1], [0, 0, 1, 1], [], []>} : vector<2x5xf32>, vector<5x9xf32>, vector<2x9xf32> -> vector<2x9xf32>
    %34 = arith.addf %24, %25 : vector<2x5xf32>
    %cst_43 = arith.constant dense<0.000000e+00> : vector<2x9xf32>
    %35 = tpu.matmul %34, %31, %cst_43 {dimension_numbers = #tpu.dot_dimension_numbers<[1], [0], [0], [1], [0, 0, 1, 1], [], []>} : vector<2x5xf32>, vector<5x9xf32>, vector<2x9xf32> -> vector<2x9xf32>
    %36 = arith.subf %32, %33 : vector<2x9xf32>
    %c2_44 = arith.constant 2 : index
    %c0_45 = arith.constant 0 : index
    %37 = vector.load %arg12[%c2_44, %c0_45] : memref<8x9xf32, #tpu.memory_space<vmem>>, vector<2x9xf32>
    tpu.vector_store %arg12[%c2_44, %c0_45], %36 {strides = array<i32>} : memref<8x9xf32, #tpu.memory_space<vmem>>, vector<2x9xf32>,
    %38 = arith.subf %35, %32 : vector<2x9xf32>
    %39 = arith.subf %38, %33 : vector<2x9xf32>
    %c2_46 = arith.constant 2 : index
    %c0_47 = arith.constant 0 : index
    %40 = vector.load %arg13[%c2_46, %c0_47] : memref<8x9xf32, #tpu.memory_space<vmem>>, vector<2x9xf32>
    tpu.vector_store %arg13[%c2_46, %c0_47], %39 {strides = array<i32>} : memref<8x9xf32, #tpu.memory_space<vmem>>, vector<2x9xf32>,
    %c4 = arith.constant 4 : index
    %c0_48 = arith.constant 0 : index
    %41 = vector.load %arg10[%c4, %c0_48] : memref<8x5xf32, #tpu.memory_space<vmem>>, vector<2x5xf32>
    %c4_49 = arith.constant 4 : index
    %c0_50 = arith.constant 0 : index
    %42 = vector.load %arg11[%c4_49, %c0_50] : memref<8x5xf32, #tpu.memory_space<vmem>>, vector<2x5xf32>
    %c2_51 = arith.constant 2 : index
    %c0_52 = arith.constant 0 : index
    %c0_53 = arith.constant 0 : index
    %43 = vector.load %arg2[%c2_51, %c0_52, %c0_53] : memref<4x5x9xf32, #tpu.memory_space<vmem>>, vector<1x5x9xf32>
    %44 = vector.shape_cast %43 : vector<1x5x9xf32> to vector<5x9xf32>
    %c2_54 = arith.constant 2 : index
    %c0_55 = arith.constant 0 : index
    %c0_56 = arith.constant 0 : index
    %45 = vector.load %arg3[%c2_54, %c0_55, %c0_56] : memref<4x5x9xf32, #tpu.memory_space<vmem>>, vector<1x5x9xf32>
    %46 = vector.shape_cast %45 : vector<1x5x9xf32> to vector<5x9xf32>
    %c2_57 = arith.constant 2 : index
    %c0_58 = arith.constant 0 : index
    %c0_59 = arith.constant 0 : index
    %47 = vector.load %arg4[%c2_57, %c0_58, %c0_59] : memref<4x5x9xf32, #tpu.memory_space<vmem>>, vector<1x5x9xf32>
    %48 = vector.shape_cast %47 : vector<1x5x9xf32> to vector<5x9xf32>
    %cst_60 = arith.constant dense<0.000000e+00> : vector<2x9xf32>
    %49 = tpu.matmul %41, %44, %cst_60 {dimension_numbers = #tpu.dot_dimension_numbers<[1], [0], [0], [1], [0, 0, 1, 1], [], []>} : vector<2x5xf32>, vector<5x9xf32>, vector<2x9xf32> -> vector<2x9xf32>
    %cst_61 = arith.constant dense<0.000000e+00> : vector<2x9xf32>
    %50 = tpu.matmul %42, %46, %cst_61 {dimension_numbers = #tpu.dot_dimension_numbers<[1], [0], [0], [1], [0, 0, 1, 1], [], []>} : vector<2x5xf32>, vector<5x9xf32>, vector<2x9xf32> -> vector<2x9xf32>
    %51 = arith.addf %41, %42 : vector<2x5xf32>
    %cst_62 = arith.constant dense<0.000000e+00> : vector<2x9xf32>
    %52 = tpu.matmul %51, %48, %cst_62 {dimension_numbers = #tpu.dot_dimension_numbers<[1], [0], [0], [1], [0, 0, 1, 1], [], []>} : vector<2x5xf32>, vector<5x9xf32>, vector<2x9xf32> -> vector<2x9xf32>
    %53 = arith.subf %49, %50 : vector<2x9xf32>
    %c4_63 = arith.constant 4 : index
    %c0_64 = arith.constant 0 : index
    %54 = vector.load %arg12[%c4_63, %c0_64] : memref<8x9xf32, #tpu.memory_space<vmem>>, vector<2x9xf32>
    tpu.vector_store %arg12[%c4_63, %c0_64], %53 {strides = array<i32>} : memref<8x9xf32, #tpu.memory_space<vmem>>, vector<2x9xf32>,
    %55 = arith.subf %52, %49 : vector<2x9xf32>
    %56 = arith.subf %55, %50 : vector<2x9xf32>
    %c4_65 = arith.constant 4 : index
    %c0_66 = arith.constant 0 : index
    %57 = vector.load %arg13[%c4_65, %c0_66] : memref<8x9xf32, #tpu.memory_space<vmem>>, vector<2x9xf32>
    tpu.vector_store %arg13[%c4_65, %c0_66], %56 {strides = array<i32>} : memref<8x9xf32, #tpu.memory_space<vmem>>, vector<2x9xf32>,
    %c6 = arith.constant 6 : index
    %c0_67 = arith.constant 0 : index
    %58 = vector.load %arg10[%c6, %c0_67] : memref<8x5xf32, #tpu.memory_space<vmem>>, vector<2x5xf32>
    %c6_68 = arith.constant 6 : index
    %c0_69 = arith.constant 0 : index
    %59 = vector.load %arg11[%c6_68, %c0_69] : memref<8x5xf32, #tpu.memory_space<vmem>>, vector<2x5xf32>
    %c3 = arith.constant 3 : index
    %c0_70 = arith.constant 0 : index
    %c0_71 = arith.constant 0 : index
    %60 = vector.load %arg2[%c3, %c0_70, %c0_71] : memref<4x5x9xf32, #tpu.memory_space<vmem>>, vector<1x5x9xf32>
    %61 = vector.shape_cast %60 : vector<1x5x9xf32> to vector<5x9xf32>
    %c3_72 = arith.constant 3 : index
    %c0_73 = arith.constant 0 : index
    %c0_74 = arith.constant 0 : index
    %62 = vector.load %arg3[%c3_72, %c0_73, %c0_74] : memref<4x5x9xf32, #tpu.memory_space<vmem>>, vector<1x5x9xf32>
    %63 = vector.shape_cast %62 : vector<1x5x9xf32> to vector<5x9xf32>
    %c3_75 = arith.constant 3 : index
    %c0_76 = arith.constant 0 : index
    %c0_77 = arith.constant 0 : index
    %64 = vector.load %arg4[%c3_75, %c0_76, %c0_77] : memref<4x5x9xf32, #tpu.memory_space<vmem>>, vector<1x5x9xf32>
    %65 = vector.shape_cast %64 : vector<1x5x9xf32> to vector<5x9xf32>
    %cst_78 = arith.constant dense<0.000000e+00> : vector<2x9xf32>
    %66 = tpu.matmul %58, %61, %cst_78 {dimension_numbers = #tpu.dot_dimension_numbers<[1], [0], [0], [1], [0, 0, 1, 1], [], []>} : vector<2x5xf32>, vector<5x9xf32>, vector<2x9xf32> -> vector<2x9xf32>
    %cst_79 = arith.constant dense<0.000000e+00> : vector<2x9xf32>
    %67 = tpu.matmul %59, %63, %cst_79 {dimension_numbers = #tpu.dot_dimension_numbers<[1], [0], [0], [1], [0, 0, 1, 1], [], []>} : vector<2x5xf32>, vector<5x9xf32>, vector<2x9xf32> -> vector<2x9xf32>
    %68 = arith.addf %58, %59 : vector<2x5xf32>
    %cst_80 = arith.constant dense<0.000000e+00> : vector<2x9xf32>
    %69 = tpu.matmul %68, %65, %cst_80 {dimension_numbers = #tpu.dot_dimension_numbers<[1], [0], [0], [1], [0, 0, 1, 1], [], []>} : vector<2x5xf32>, vector<5x9xf32>, vector<2x9xf32> -> vector<2x9xf32>
    %70 = arith.subf %66, %67 : vector<2x9xf32>
    %c6_81 = arith.constant 6 : index
    %c0_82 = arith.constant 0 : index
    %71 = vector.load %arg12[%c6_81, %c0_82] : memref<8x9xf32, #tpu.memory_space<vmem>>, vector<2x9xf32>
    tpu.vector_store %arg12[%c6_81, %c0_82], %70 {strides = array<i32>} : memref<8x9xf32, #tpu.memory_space<vmem>>, vector<2x9xf32>,
    %72 = arith.subf %69, %66 : vector<2x9xf32>
    %73 = arith.subf %72, %67 : vector<2x9xf32>
    %c6_83 = arith.constant 6 : index
    %c0_84 = arith.constant 0 : index
    %74 = vector.load %arg13[%c6_83, %c0_84] : memref<8x9xf32, #tpu.memory_space<vmem>>, vector<2x9xf32>
    tpu.vector_store %arg13[%c6_83, %c0_84], %73 {strides = array<i32>} : memref<8x9xf32, #tpu.memory_space<vmem>>, vector<2x9xf32>,
    %c0_85 = arith.constant 0 : index
    %c0_86 = arith.constant 0 : index
    %75 = vector.load %arg12[%c0_85, %c0_86] : memref<8x9xf32, #tpu.memory_space<vmem>>, vector<8x9xf32>
    %c0_87 = arith.constant 0 : index
    %c0_88 = arith.constant 0 : index
    %76 = vector.load %arg7[%c0_87, %c0_88] : memref<9x16xf32, #tpu.memory_space<vmem>>, vector<9x16xf32>
    %cst_89 = arith.constant dense<0.000000e+00> : vector<8x16xf32>
    %77 = tpu.matmul %75, %76, %cst_89 {dimension_numbers = #tpu.dot_dimension_numbers<[1], [0], [0], [1], [0, 0, 1, 1], [], []>} : vector<8x9xf32>, vector<9x16xf32>, vector<8x16xf32> -> vector<8x16xf32>
    %c0_90 = arith.constant 0 : index
    %c0_91 = arith.constant 0 : index
    %78 = vector.load %arg13[%c0_90, %c0_91] : memref<8x9xf32, #tpu.memory_space<vmem>>, vector<8x9xf32>
    %c0_92 = arith.constant 0 : index
    %c0_93 = arith.constant 0 : index
    %79 = vector.load %arg8[%c0_92, %c0_93] : memref<9x16xf32, #tpu.memory_space<vmem>>, vector<9x16xf32>
    %cst_94 = arith.constant dense<0.000000e+00> : vector<8x16xf32>
    %80 = tpu.matmul %78, %79, %cst_94 {dimension_numbers = #tpu.dot_dimension_numbers<[1], [0], [0], [1], [0, 0, 1, 1], [], []>} : vector<8x9xf32>, vector<9x16xf32>, vector<8x16xf32> -> vector<8x16xf32>
    %81 = arith.addf %77, %80 : vector<8x16xf32>
    %c0_95 = arith.constant 0 : index
    %c0_96 = arith.constant 0 : index
    %82 = vector.load %arg9[%c0_95, %c0_96] : memref<8x16xf32, #tpu.memory_space<vmem>>, vector<8x16xf32>
    tpu.vector_store %arg9[%c0_95, %c0_96], %81 {strides = array<i32>} : memref<8x16xf32, #tpu.memory_space<vmem>>, vector<8x16xf32>,
    return
  }
  func.func @transform_0(%arg0: i32) -> (i32, i32) {
    %c0_i32 = arith.constant 0 : i32
    %c0_i32_0 = arith.constant 0 : i32
    return %arg0, %c0_i32 : i32, i32
  }
  func.func @transform_1(%arg0: i32) -> (i32, i32, i32) {
    %c0_i32 = arith.constant 0 : i32
    %c0_i32_0 = arith.constant 0 : i32
    %c0_i32_1 = arith.constant 0 : i32
    return %arg0, %c0_i32, %c0_i32_0 : i32, i32, i32
  }
  func.func @transform_2(%arg0: i32) -> (i32, i32, i32) {
    %c0_i32 = arith.constant 0 : i32
    %c0_i32_0 = arith.constant 0 : i32
    %c0_i32_1 = arith.constant 0 : i32
    return %arg0, %c0_i32, %c0_i32_0 : i32, i32, i32
  }
  func.func @transform_3(%arg0: i32) -> (i32, i32, i32) {
    %c0_i32 = arith.constant 0 : i32
    %c0_i32_0 = arith.constant 0 : i32
    %c0_i32_1 = arith.constant 0 : i32
    return %arg0, %c0_i32, %c0_i32_0 : i32, i32, i32
  }
  func.func @transform_4(%arg0: i32) -> (i32, i32) {
    %c0_i32 = arith.constant 0 : i32
    %c0_i32_0 = arith.constant 0 : i32
    %c0_i32_1 = arith.constant 0 : i32
    return %c0_i32, %c0_i32_0 : i32, i32
  }
  func.func @transform_5(%arg0: i32) -> (i32, i32) {
    %c0_i32 = arith.constant 0 : i32
    %c0_i32_0 = arith.constant 0 : i32
    %c0_i32_1 = arith.constant 0 : i32
    return %c0_i32, %c0_i32_0 : i32, i32
  }
  func.func @transform_6(%arg0: i32) -> (i32, i32) {
    %c0_i32 = arith.constant 0 : i32
    %c0_i32_0 = arith.constant 0 : i32
    %c0_i32_1 = arith.constant 0 : i32
    return %c0_i32, %c0_i32_0 : i32, i32
  }
  func.func @transform_7(%arg0: i32) -> (i32, i32) {
    %c0_i32 = arith.constant 0 : i32
    %c0_i32_0 = arith.constant 0 : i32
    %c0_i32_1 = arith.constant 0 : i32
    return %c0_i32, %c0_i32_0 : i32, i32
  }
  func.func @transform_8(%arg0: i32) -> (i32, i32) {
    %c0_i32 = arith.constant 0 : i32
    %c0_i32_0 = arith.constant 0 : i32
    return %arg0, %c0_i32 : i32, i32
  }
}

</mosaic_0001>

<bundles_post_ra>
// kernel: tpu_custom_call.1
= control target key start
LH: loop header
LB: loop body
LE: loop exit
PB: predicated region body
PF: predicated region fallthrough
CT: control target
= control target key end

     0   :  { %vm32_vm0 = vcmask 64512   ;;  %v1519_v2 = vmov 0.0   ;;  %vm1520_vm1 = vmmov 0   ;;  %s1726_s0 = inlined_call_operand.vmem [shape: f32[8,8], index: 0, kind: input, shape index: {}]   ;;  %s1727_s1 = inlined_call_operand.vmem [shape: f32[4,5,9], index: 1, kind: input, shape index: {}]   ;;  %s1728_s2 = inlined_call_operand.vmem [shape: f32[4,5,9], index: 2, kind: input, shape index: {}]   ;;  %s1729_s3 = inlined_call_operand.vmem [shape: f32[4,5,9], index: 3, kind: input, shape index: {}]   ;;  %s1730_s4 = inlined_call_operand.vmem [shape: f32[8,5], index: 4, kind: input, shape index: {}]   ;;  %s1731_s5 = inlined_call_operand.vmem [shape: f32[8,5], index: 5, kind: input, shape index: {}]   ;;  %s1732_s6 = inlined_call_operand.vmem [shape: f32[9,16], index: 6, kind: input, shape index: {}]   ;;  %s1733_s7 = inlined_call_operand.vmem [shape: f32[9,16], index: 7, kind: input, shape index: {}]   ;;  %s1734_s8 = inlined_call_operand.hbm [shape: f32[8,16], index: 8, kind: output, shape index: {}]  }
   0x1   :  { %v31_v0 = vld [vmem:[%s1730_s4] sm:$0xff]  ;;  %1396 = vmatprep.subr.mxu1 %v1519_v2  ;;  %1398 = vmatprep.mubr.msk.f32.mxu1 %vm1520_vm1, %v1519_v2 }
   0x2   :  { %v30_v1 = vld [vmem:[%s1726_s0] sm:$0xff] }
   0x3   :  { %v108_v3 = vld [vmem:[%s1731_s5] sm:$0xff] }
   0x4   :  { %13 = vsyncpa [#allocation7], 0  ;;  %1397 = vmatpush3.msra.mxu1 %v31_v0  ;;  %1406 = vmatprep.subr.mxu0 %v1519_v2  ;;  %v182_v4 = vld [vmem:[%s1727_s1] sm:$0x1f]  ;;  %vm188_vm2 = vcmask 1044480   ;;  %vm106_vm3 = vcmask 39936  }
   0x5   :  { %1399 = vmatmul.mubr.msk.f32.vlgmr.msra.gmra.mrb[0].mxu1 %vm32_vm0, %v30_v1  ;;  %1401 = vmatprep.subr.mxu1 %v1519_v2  ;;  %v183_v5 = vld [vmem:[%s1728_s2] sm:$0x1f]  ;;  %v1331_v12 = vld [vmem:[%s1727_s1 + $0x8] sm:$0x1f]  ;;  %v1340_v19 = vld [vmem:[%s1727_s1 + $0x10] sm:$0x1f] }
   0x6   :  { %1402 = vmatpush3.msra.mxu1 %v108_v3  ;;  %1403 = vmatprep.mubr.msk.f32.mxu1 %vm1520_vm1, %v1519_v2  ;;  %v184_v10 = vld [vmem:[%s1729_s3] sm:$0x1f]  ;;  %v1332_v15 = vld [vmem:[%s1728_s2 + $0x8] sm:$0x1f]  ;;  %v1341_v21 = vld [vmem:[%s1728_s2 + $0x10] sm:$0x1f] }
   0x7   :  { %1408 = vmatprep.mubr.msk.f32.mxu0 %vm1520_vm1, %v1519_v2  ;;  %1411 = vmatprep.subr.mxu1 %v1519_v2  ;;  %v1333_v16 = vld [vmem:[%s1729_s3 + $0x8] sm:$0x1f]  ;;  %v1342_v22 = vld [vmem:[%s1729_s3 + $0x10] sm:$0x1f]  ;;  %v1349_v25 = vld [vmem:[%s1727_s1 + $0x18] sm:$0x1f] }
   0x8   :  { %1407 = vmatpush3.msk.msra.mxu0 %vm188_vm2, %v182_v4  ;;  %v1350_v27 = vld [vmem:[%s1728_s2 + $0x18] sm:$0x1f]  ;;  %v1151_v32 = vld [vmem:[%s1733_s7] sm:$0xff]  ;;  %v1152_v33 = vld [vmem:[%s1733_s7 + $0x8] sm:$0x1]  ;;  %vm1157_vm4 = vcmask 1040384  }
   0x9   :  { %1404 = vmatmul.mubr.msk.f32.vlgmr.msra.gmra.mrb[2].mxu1 %vm32_vm0, %v30_v1  ;;  %1416 = vmatprep.subr.mxu0 %v1519_v2  ;;  %v1351_v28 = vld [vmem:[%s1729_s3 + $0x18] sm:$0x1f]  ;;  %v1521_v34 = vmov 0.0|0.0   ;;  %v1481_v35 = vpack.c.bf16 %v1152_v33, %v1151_v32  ;;  %vm1522_vm5 = vmmov 1   ;;  %vm416_vm7 = vcmask 66560   ;;  %s1523_s11 = smov [#allocation6]  }
   0xa   :  { %1413 = vmatprep.mubr.msk.f32.mxu1 %vm1520_vm1, %v1519_v2  ;;  %1412 = vmatpush3.msk.msra.mxu1 %vm188_vm2, %v183_v5  ;;  %vm1690_vm6 = vmpackc.low %vm1157_vm4, %vm1522_vm5  ;;  %vm1153_vm8 = vcmask 72704   ;;  %s1315_s12 = sshll.u32 %s1523_s11, 4  ;;  %vm1307_vm9 = vcmask 130048   ;;  %s1316_s12 = int_to_ptr.vmem [resolvable:$true] %s1315_s12 }
   0xb   :  { %1421 = vmatprep.subr.mxu1 %v1519_v2  ;;  %p1500_p1 = scmp.lt.s32.totalorder %s1316_s12, %s1316_s12 }
  0xd8   :  { %v102_v6 = vpop.f32.mrb[0].mxu1 }
  0xd9   :  { %107 = vst.msk [vmem:[#allocation2] sm:$0xff] %vm106_vm3, %v102_v6  ;;  %v1400_v7 = vpop.f32.mrb[1].mxu1 }
  0xdc   :  { %v175_v8 = vpop.f32.mrb[2].mxu1 }
  0xdd   :  { %179 = vst.msk [vmem:[#allocation3] sm:$0xff] %vm106_vm3, %v175_v8  ;;  %v1405_v9 = vpop.f32.mrb[3].mxu1 }
  0xe0   :  { %v180_v11 = vld [vmem:[#allocation2] sm:$0x3]  ;;  %v421_v17 = vld [vmem:[#allocation2 + $0x2] sm:$0x3]  ;;  %v663_v23 = vld [vmem:[#allocation2 + $0x4] sm:$0x3] }
  0xe1   :  { %1409 = vmatmul.mubr.msk.f32.vlgmr.msra.gmra.mrb[0].mxu0 %vm106_vm3, %v180_v11  ;;  %v905_v29 = vld [vmem:[#allocation2 + $0x6] sm:$0x3] }
  0xe2   :  { %1417 = vmatpush3.msk.msra.mxu0 %vm188_vm2, %v184_v10  ;;  %1418 = vmatprep.mubr.msk.f32.mxu0 %vm1520_vm1, %v1519_v2  ;;  %v1148_v10 = vld [vmem:[%s1732_s6] sm:$0xff] }
  0xe3   :  { %1426 = vmatprep.subr.mxu0 %v1519_v2 }
  0xe4   :  { %v181_v13 = vld [vmem:[#allocation3] sm:$0x3]  ;;  %v422_v18 = vld [vmem:[#allocation3 + $0x2] sm:$0x3]  ;;  %v664_v24 = vld [vmem:[#allocation3 + $0x4] sm:$0x3] }
  0xe5   :  { %v338_v14 = vadd.f32 %v181_v13, %v180_v11  ;;  %1414 = vmatmul.mubr.msk.f32.vlgmr.msra.gmra.mrb[4].mxu1 %vm106_vm3, %v181_v13  ;;  %v581_v20 = vadd.f32 %v422_v18, %v421_v17  ;;  %v823_v26 = vadd.f32 %v664_v24, %v663_v23  ;;  %v906_v30 = vld [vmem:[#allocation3 + $0x6] sm:$0x3]  ;;  %v1149_v11 = vld [vmem:[%s1732_s6 + $0x8] sm:$0x1]  ;;  %s1495_s6 = scalar_lea.vmem %s1316_s12, 128 }
  0xe6   :  { %1422 = vmatpush3.msk.msra.mxu1 %vm188_vm2, %v1331_v12  ;;  %1423 = vmatprep.mubr.msk.f32.mxu1 %vm1520_vm1, %v1519_v2  ;;  %v1065_v31 = vadd.f32 %v906_v30, %v905_v29  ;;  %v1485_v12 = vpack.c.bf16 %v1149_v11, %v1148_v10  ;;  %p1496_p0 = scmp.ne.s32.totalorder %s1316_s12, %s1495_s6  ;;  %p1501_p2 = scmp.lt.s32.totalorder %s1495_s6, %s1495_s6 }
  0xe7   :  { %1419 = vmatmul.mubr.msk.f32.vlgmr.msra.gmra.mrb[2].mxu0 %vm106_vm3, %v338_v14  ;;  %1431 = vmatprep.subr.mxu1 %v1519_v2 }
  0xe8   :  { %1427 = vmatpush3.msk.msra.mxu0 %vm188_vm2, %v1332_v15  ;;  %1428 = vmatprep.mubr.msk.f32.mxu0 %vm1520_vm1, %v1519_v2  ;;  %p1502_p3 = por %p1501_p2, %p1500_p1 }
  0xe9   :  { %1424 = vmatmul.mubr.msk.f32.vlgmr.msra.gmra.mrb[6].mxu1 %vm106_vm3, %v421_v17  ;;  %1436 = vmatprep.subr.mxu0 %v1519_v2 }
  0xea   :  { %1432 = vmatpush3.msk.msra.mxu1 %vm188_vm2, %v1333_v16  ;;  %1433 = vmatprep.mubr.msk.f32.mxu1 %vm1520_vm1, %v1519_v2  ;;  %p1503_p4 = pnand %p1502_p3, %p1496_p0 }
  0xeb   :  { %1429 = vmatmul.mubr.msk.f32.vlgmr.msra.gmra.mrb[4].mxu0 %vm106_vm3, %v422_v18  ;;  %1441 = vmatprep.subr.mxu1 %v1519_v2 }
  0xec   :  { %1437 = vmatpush3.msk.msra.mxu0 %vm188_vm2, %v1340_v19  ;;  %1438 = vmatprep.mubr.msk.f32.mxu0 %vm1520_vm1, %v1519_v2 }
  0xed   :  { %1434 = vmatmul.mubr.msk.f32.vlgmr.msra.gmra.mrb[8].mxu1 %vm106_vm3, %v581_v20  ;;  %1446 = vmatprep.subr.mxu0 %v1519_v2 }
  0xee   :  { %1442 = vmatpush3.msk.msra.mxu1 %vm188_vm2, %v1341_v21  ;;  %1443 = vmatprep.mubr.msk.f32.mxu1 %vm1520_vm1, %v1519_v2 }
  0xef   :  { %1439 = vmatmul.mubr.msk.f32.vlgmr.msra.gmra.mrb[6].mxu0 %vm106_vm3, %v663_v23  ;;  %1451 = vmatprep.subr.mxu1 %v1519_v2 }
  0xf0   :  { %1447 = vmatpush3.msk.msra.mxu0 %vm188_vm2, %v1342_v22  ;;  %1448 = vmatprep.mubr.msk.f32.mxu0 %vm1520_vm1, %v1519_v2 }
  0xf1   :  { %1444 = vmatmul.mubr.msk.f32.vlgmr.msra.gmra.mrb[10].mxu1 %vm106_vm3, %v664_v24  ;;  %1456 = vmatprep.subr.mxu0 %v1519_v2 }
  0xf2   :  { %1452 = vmatpush3.msk.msra.mxu1 %vm188_vm2, %v1349_v25  ;;  %1453 = vmatprep.mubr.msk.f32.mxu1 %vm1520_vm1, %v1519_v2 }
  0xf3   :  { %1449 = vmatmul.mubr.msk.f32.vlgmr.msra.gmra.mrb[8].mxu0 %vm106_vm3, %v823_v26  ;;  %1461 = vmatprep.subr.mxu1 %v1519_v2 }
  0xf4   :  { %1457 = vmatpush3.msk.msra.mxu0 %vm188_vm2, %v1350_v27  ;;  %1458 = vmatprep.mubr.msk.f32.mxu0 %vm1520_vm1, %v1519_v2 }
  0xf5   :  { %1454 = vmatmul.mubr.msk.f32.vlgmr.msra.gmra.mrb[12].mxu1 %vm106_vm3, %v905_v29  ;;  %1480 = vmatprep.subr.bf16.mxu0 %v1521_v34 }
  0xf6   :  { %1462 = vmatpush3.msk.msra.mxu1 %vm188_vm2, %v1351_v28  ;;  %1463 = vmatprep.mubr.msk.f32.mxu1 %vm1520_vm1, %v1519_v2 }
  0xf7   :  { %1459 = vmatmul.mubr.msk.f32.vlgmr.msra.gmra.mrb[10].mxu0 %vm106_vm3, %v906_v30 }
  0xf8   :  { %1470 = vmatprep.mubr.msk.f32.mxu0 %vm1520_vm1, %v1519_v2  ;;  %1483 = vmatpush3.bf16.msk.msra.mxu0 %vm1690_vm6, %v1481_v35 }
  0xf9   :  { %1464 = vmatmul.mubr.msk.f32.vlgmr.msra.gmra.mrb[14].mxu1 %vm106_vm3, %v1065_v31  ;;  %1484 = vmatprep.subr.bf16.mxu0 %v1521_v34 }
 0x1b4   :  { %v258_v37 = vpop.f32.mrb[0].mxu0 }
 0x1b5   :  { %v1410_v38 = vpop.f32.mrb[1].mxu0 }
 0x1b8   :  { %v334_v39 = vpop.f32.mrb[4].mxu1 }
 0x1b9   :  { %v415_v40 = vsub.f32 %v258_v37, %v334_v39  ;;  %v1415_v41 = vpop.f32.mrb[5].mxu1 }
 0x1ba   :  { %v411_v42 = vpop.f32.mrb[2].mxu0 }
 0x1bb   :  { %417 = vst.msk [vmem:[#allocation4] sm:$0x3] %vm416_vm7, %v415_v40  ;;  %v418_v43 = vsub.f32 %v411_v42, %v258_v37  ;;  %v1420_v44 = vpop.f32.mrb[3].mxu0 }
 0x1bc   :  { %v501_v45 = vpop.f32.mrb[6].mxu1 }
 0x1bd   :  { %v419_v46 = vsub.f32 %v418_v43, %v334_v39  ;;  %v1425_v47 = vpop.f32.mrb[7].mxu1 }
 0x1be   :  { %v577_v48 = vpop.f32.mrb[4].mxu0 }
 0x1bf   :  { %420 = vst.msk [vmem:[#allocation5] sm:$0x3] %vm416_vm7, %v419_v46  ;;  %v658_v49 = vsub.f32 %v501_v45, %v577_v48  ;;  %v1430_v50 = vpop.f32.mrb[5].mxu0 }
 0x1c0   :  { %v654_v51 = vpop.f32.mrb[8].mxu1 }
 0x1c1   :  { %659 = vst.msk [vmem:[#allocation4 + $0x2] sm:$0x3] %vm416_vm7, %v658_v49  ;;  %v660_v52 = vsub.f32 %v654_v51, %v501_v45  ;;  %v1435_v53 = vpop.f32.mrb[9].mxu1 }
 0x1c2   :  { %v743_v54 = vpop.f32.mrb[6].mxu0 }
 0x1c3   :  { %v661_v55 = vsub.f32 %v660_v52, %v577_v48  ;;  %v1440_v56 = vpop.f32.mrb[7].mxu0 }
 0x1c4   :  { %v819_v57 = vpop.f32.mrb[10].mxu1 }
 0x1c5   :  { %662 = vst.msk [vmem:[#allocation5 + $0x2] sm:$0x3] %vm416_vm7, %v661_v55  ;;  %v900_v58 = vsub.f32 %v743_v54, %v819_v57  ;;  %v1445_v59 = vpop.f32.mrb[11].mxu1 }
 0x1c6   :  { %v896_v60 = vpop.f32.mrb[8].mxu0 }
 0x1c7   :  { %901 = vst.msk [vmem:[#allocation4 + $0x4] sm:$0x3] %vm416_vm7, %v900_v58  ;;  %v902_v61 = vsub.f32 %v896_v60, %v743_v54  ;;  %v1450_v62 = vpop.f32.mrb[9].mxu0 }
 0x1c8   :  { %v985_v63 = vpop.f32.mrb[12].mxu1 }
 0x1c9   :  { %v903_v0 = vsub.f32 %v902_v61, %v819_v57  ;;  %v1455_v1 = vpop.f32.mrb[13].mxu1 }
 0x1ca   :  { %v1061_v3 = vpop.f32.mrb[10].mxu0 }
 0x1cb   :  { %904 = vst.msk [vmem:[#allocation5 + $0x4] sm:$0x3] %vm416_vm7, %v903_v0  ;;  %v1142_v4 = vsub.f32 %v985_v63, %v1061_v3  ;;  %v1460_v5 = vpop.f32.mrb[11].mxu0 }
 0x1cc   :  { %v1138_v6 = vpop.f32.mrb[14].mxu1 }
 0x1cd   :  { %1143 = vst.msk [vmem:[#allocation4 + $0x6] sm:$0x3] %vm416_vm7, %v1142_v4  ;;  %v1144_v7 = vsub.f32 %v1138_v6, %v985_v63  ;;  %v1465_v8 = vpop.f32.mrb[15].mxu1 }
 0x1cf   :  { %v1145_v9 = vsub.f32 %v1144_v7, %v1061_v3 }
 0x1d1   :  { %1146 = vst.msk [vmem:[#allocation5 + $0x6] sm:$0x3] %vm416_vm7, %v1145_v9 }
 0x1d4   :  { %v1147_v14 = vld [vmem:[#allocation4] sm:$0xff] }
 0x1d8   :  { %v1150_v13 = vld [vmem:[#allocation5] sm:$0xff] }
 0x1d9   :  { %1471 = vmatmul.mubr.msk.f32.vlgmr.msra.gmra.mrb[12].mxu0 %vm1153_vm8, %v1150_v13 }
 0x1da   :  { %1487 = vmatpush3.bf16.msk.msra.mxu0 %vm1690_vm6, %v1485_v12  ;;  %1477 = vmatprep.mubr.msk.f32.mxu0 %vm1520_vm1, %v1519_v2 }
 0x1e1   :  { %1478 = vmatmul.mubr.msk.f32.vlgmr.msra.gmra.mrb[12].mxu0 %vm1153_vm8, %v1147_v14 }
 0x2b4   :  { %v1303_v15 = vpop.f32.mrb[12].mxu0 }
 0x2b5   :  { %1308 = vst.msk [vmem:[#allocation6] sm:$0xff] %vm1307_vm9, %v1303_v15  ;;  %v1479_v16 = vpop.f32.mrb[13].mxu0 }
 0x2b6   :  { %1506 = shalt.err (!%p1503_p4)
}
 0x2b7   :  { %s1507_s15 = scalar_lea.hbm %s1734_s8, 128 }
 0x2b8   :  { %p1508_p5 = scmp.ne.s32.totalorder %s1734_s8, %s1507_s15  ;;  %p1511_p6 = scmp.lt.u32.totalorder %s1507_s15, %s1734_s8 }
 0x2ba   :  { %p1513_p7 = pnand %p1511_p6, %p1508_p5 }
 0x2bc   :  { %1516 = shalt.err (!%p1513_p7)
}
 0x2bd   :  { %1318 = dma.vmem_to_hbm [thread:$0]  %s1316_s12, 128, %s1734_s8, [#allocation7]  }
 0x2be   :  { %1517 = dma.done.wait [#allocation7], 128  }
 0x2bf   :  { %1518 = vsyncadd [#allocation7], 4294967168 }
 0x2c0   :  { %1322 = vsyncpa [#allocation7], 1 }

</bundles_post_ra>
